<compile_context>
chip_gen: v6e
topology: v6e:2x2x1
jax: 0.10.0
libtpu: 0.0.40
codegen_flags: <defaults>
</compile_context>

<pallas_src>
import jax
import jax.numpy as jnp
from jax.experimental import pallas as pl
from jax.experimental.pallas import tpu as pltpu

_LANE = 128
_SUBLANE = 8
_TILE_B_CAP = 8192  # rows per grid step (step overhead ~0.35us dominates small tiles)


def _round_up(n, m):
    return ((n + m - 1) // m) * m


# ----------------------------- kernels ---------------------------------------


def _dqn_masked_kernel(x_ref, w1_ref, b1_ref, w2_ref, b2_ref, w3_ref, b3_ref,
                       mask_ref, o_ref):
    h = jnp.dot(x_ref[...], w1_ref[...], preferred_element_type=jnp.float32)
    h = jnp.maximum(h + b1_ref[...], 0.0)
    h = jnp.dot(h, w2_ref[...], preferred_element_type=jnp.float32)
    h = jnp.maximum(h + b2_ref[...], 0.0)
    q = jnp.dot(h, w3_ref[...], preferred_element_type=jnp.float32) + b3_ref[...]
    # masked_fill(~mask, -inf); mask is int32 (1 = keep).
    o_ref[...] = jnp.where(mask_ref[...] != 0, q, -jnp.inf)


def _dqn_nomask_kernel(x_ref, w1_ref, b1_ref, w2_ref, b2_ref, w3_ref, b3_ref,
                       o_ref):
    h = jnp.dot(x_ref[...], w1_ref[...], preferred_element_type=jnp.float32)
    h = jnp.maximum(h + b1_ref[...], 0.0)
    h = jnp.dot(h, w2_ref[...], preferred_element_type=jnp.float32)
    h = jnp.maximum(h + b2_ref[...], 0.0)
    o_ref[...] = (jnp.dot(h, w3_ref[...], preferred_element_type=jnp.float32)
                  + b3_ref[...])


# ----------------------------- wrapper ----------------------------------------


def prepare_params(params, dtype=jnp.float32):
    """One-time glue: transpose weights to (in, out), reshape biases to (1, F).
    Call once and reuse; no padding is needed anymore (blocks use full feature dims)."""
    w1 = jnp.asarray(params['fc1.weight'], dtype)
    b1 = jnp.asarray(params['fc1.bias'], dtype)
    w2 = jnp.asarray(params['fc2.weight'], dtype)
    b2 = jnp.asarray(params['fc2.bias'], dtype)
    w3 = jnp.asarray(params['fc3.weight'], dtype)
    b3 = jnp.asarray(params['fc3.bias'], dtype)

    hidden_dim, state_dim = w1.shape
    action_dim = w3.shape[0]

    return {
        'w1t': w1.T, 'b1': b1.reshape(1, hidden_dim),
        'w2t': w2.T, 'b2': b2.reshape(1, hidden_dim),
        'w3t': w3.T, 'b3': b3.reshape(1, action_dim),
        'state_dim': state_dim, 'hidden_dim': hidden_dim,
        'action_dim': action_dim,
    }


def meta_masked_dqn_forward(x, params, mask=None, *, tile_b=None):
    """Forward pass of MetaMaskedDQN.

    x:      (B, state_dim) float
    params: either the raw PyTorch-style dict ('fc{1,2,3}.weight'/'fc{1,2,3}.bias')
            or the output of prepare_params() (preferred: prepare once, reuse;
            raw params are re-prepared inside the traced wrapper each call).
    mask:   optional (B, action_dim) bool; True = allowed action.
    """
    prep = params if 'w1t' in params else prepare_params(params)
    x = jnp.asarray(x, jnp.float32)
    B, state_dim = x.shape
    assert state_dim == prep['state_dim']
    hidden_dim = prep['hidden_dim']
    action_dim = prep['action_dim']

    # --- generation-aware VMEM capacity (v7x 64 MiB; v5e/v6e 128 MiB) ---
    try:
        vmem_cap = int(pltpu.get_tpu_info().vmem_capacity_bytes)
    except Exception:  # pragma: no cover - conservative fallback
        vmem_cap = 64 << 20
    vmem_budget = (vmem_cap * 3) // 4  # headroom for compiler scratch

    # --- VMEM footprint of one grid step (double-buffered, (8,128)-padded in VMEM) ---
    def _blk(rows, cols, buffers=2):
        return _round_up(rows, _SUBLANE) * _round_up(cols, _LANE) * 4 * buffers

    def _vmem_estimate(tb):
        total = (_blk(tb, state_dim) +                                        # x
                 _blk(state_dim, hidden_dim) + _blk(1, hidden_dim) +          # w1t, b1
                 _blk(hidden_dim, hidden_dim) + _blk(1, hidden_dim) +         # w2t, b2
                 _blk(hidden_dim, action_dim) + _blk(1, action_dim) +         # w3t, b3
                 _blk(tb, action_dim))                                        # out
        if mask is not None:
            total += _blk(tb, action_dim)                                     # mask
        return total

    # --- choose batch tile ---
    if tile_b is None:
        if B <= _TILE_B_CAP:
            tile_b = B  # single block: block dims == full array dims, always legal
            if B >= 1024:
                # v7x megacore: >= 2 grid steps so both TensorCores get work; the
                # extra ~0.35us step is noise on 1-TC chips at this size.
                tile_b = _round_up(pl.cdiv(B, 2), _SUBLANE)
        else:
            tile_b = _TILE_B_CAP  # multiple of 8; cdiv grid handles the remainder
        while _vmem_estimate(tile_b) > vmem_budget and tile_b > _SUBLANE:
            tile_b = max(_SUBLANE, (tile_b // 2 // _SUBLANE) * _SUBLANE)
    else:
        assert tile_b == B or tile_b % _SUBLANE == 0, (
            "tile_b must be the full batch or a multiple of 8 (f32 sublane tile)")

    nb = pl.cdiv(B, tile_b)  # partial last block: OOB reads row-local, OOB writes dropped

    # --- compiler params: megacore batch sharding; always pin vmem limit (v5e-safe) ---
    est = _vmem_estimate(tile_b)
    vmem_limit = int(min(vmem_cap, max(est + (8 << 20), 16 << 20)))
    compiler_params = pltpu.CompilerParams(
        dimension_semantics=("parallel",),
        vmem_limit_bytes=vmem_limit,
    )

    full = lambda r, c: pl.BlockSpec((r, c), lambda i: (0, 0))
    x_spec = pl.BlockSpec((tile_b, state_dim), lambda i: (i, 0))
    qa_spec = pl.BlockSpec((tile_b, action_dim), lambda i: (i, 0))
    weight_specs = [
        full(state_dim, hidden_dim), full(1, hidden_dim),    # w1t, b1
        full(hidden_dim, hidden_dim), full(1, hidden_dim),   # w2t, b2
        full(hidden_dim, action_dim), full(1, action_dim),   # w3t, b3
    ]
    weight_args = (prep['w1t'], prep['b1'], prep['w2t'], prep['b2'],
                   prep['w3t'], prep['b3'])

    if mask is not None:
        m = jnp.asarray(mask).astype(jnp.int32)  # (B, action_dim), no padding
        kernel = _dqn_masked_kernel
        in_specs = [x_spec] + weight_specs + [qa_spec]
        args = (x,) + weight_args + (m,)
    else:
        kernel = _dqn_nomask_kernel
        in_specs = [x_spec] + weight_specs
        args = (x,) + weight_args

    out = pl.pallas_call(
        kernel,
        out_shape=jax.ShapeDtypeStruct((B, action_dim), jnp.float32),
        grid_spec=pltpu.PrefetchScalarGridSpec(
            num_scalar_prefetch=0,
            grid=(nb,),
            in_specs=in_specs,
            out_specs=qa_spec,
        ),
        compiler_params=compiler_params,
    )(*args)

    return out


# ----------------------------- reference & test -------------------------------


def _reference_forward(x, params, mask=None):
    h = jax.nn.relu(x @ params['fc1.weight'].T + params['fc1.bias'])
    h = jax.nn.relu(h @ params['fc2.weight'].T + params['fc2.bias'])
    q = h @ params['fc3.weight'].T + params['fc3.bias']
    if mask is not None:
        q = jnp.where(mask, q, -jnp.inf)
    return q


def _init_params(key, state_dim, hidden_dim, action_dim):
    """Deterministic init mirroring nn.Linear shapes."""
    ks = jax.random.split(key, 6)

    def linear(kw, kb, fan_in, fan_out):
        bound = 1.0 / jnp.sqrt(fan_in)
        w = jax.random.uniform(kw, (fan_out, fan_in), jnp.float32, -bound, bound)
        b = jax.random.uniform(kb, (fan_out,), jnp.float32, -bound, bound)
        return w, b

    w1, b1 = linear(ks[0], ks[1], state_dim, hidden_dim)
    w2, b2 = linear(ks[2], ks[3], hidden_dim, hidden_dim)
    w3, b3 = linear(ks[4], ks[5], hidden_dim, action_dim)
    return {'fc1.weight': w1, 'fc1.bias': b1,
            'fc2.weight': w2, 'fc2.bias': b2,
            'fc3.weight': w3, 'fc3.bias': b3}


def _masked_close(q, q_ref):
    finite = jnp.isfinite(q_ref)
    if q.shape != q_ref.shape:
        return False
    if not bool(jnp.all(jnp.isfinite(q) == finite)):
        return False
    return bool(jnp.allclose(jnp.where(finite, q, 0.0),
                             jnp.where(finite, q_ref, 0.0),
                             atol=1e-5, rtol=1e-5))


# TODO(synk): clone_state()/adapt() (MAML inner-loop autograd updates) are training
# utilities, not part of the forward pass, and are not implemented as kernels.

if __name__ == "__main__":
    key = jax.random.PRNGKey(0)
    k_param, k_x, k_mask = jax.random.split(key, 3)

    B, state_dim, hidden_dim, action_dim = 24, 16, 32, 8
    params = _init_params(k_param, state_dim, hidden_dim, action_dim)
    prep = prepare_params(params)  # hoisted glue: transpose/reshape exactly once

    x = jax.random.normal(k_x, (B, state_dim), jnp.float32)
    mask = jax.random.bernoulli(k_mask, 0.7, (B, action_dim))
    mask = mask.at[:, 0].set(True)  # keep at least one action valid per row
    q_ref = _reference_forward(x, params, mask)

    # masked path, multi-step grid (tile_b=8 -> 3 grid steps, exercises pipelining)
    q = jax.block_until_ready(meta_masked_dqn_forward(x, prep, mask, tile_b=8))
    assert _masked_close(q, q_ref)

    # masked path, default tile selection (single full-batch block)
    q_d = jax.block_until_ready(meta_masked_dqn_forward(x, prep, mask))
    assert _masked_close(q_d, q_ref)

    # partial last block: B not a multiple of tile_b (OOB rows dropped on writeback)
    B2 = 13
    q_p = jax.block_until_ready(
        meta_masked_dqn_forward(x[:B2], prep, mask[:B2], tile_b=8))
    assert _masked_close(q_p, _reference_forward(x[:B2], params, mask[:B2]))

    # maskless path (separate kernel variant; no mask array streamed from HBM)
    q2 = jax.block_until_ready(meta_masked_dqn_forward(x, prep, None))
    assert bool(jnp.allclose(q2, _reference_forward(x, params, None),
                             atol=1e-5, rtol=1e-5))

    # raw PyTorch-style params are also accepted (prepared on the fly)
    q3 = jax.block_until_ready(meta_masked_dqn_forward(x, params, mask))
    assert _masked_close(q3, q_ref)

    print("KERNEL_OK")
</pallas_src>

<mosaic_0001>
module attributes {stable_mosaic.version = 11 : i64} {
  func.func @_dqn_masked_kernel(%arg0: i32, %arg1: memref<8x16xf32, #tpu.memory_space<vmem>>, %arg2: memref<16x32xf32, #tpu.memory_space<vmem>>, %arg3: memref<1x32xf32, #tpu.memory_space<vmem>>, %arg4: memref<32x32xf32, #tpu.memory_space<vmem>>, %arg5: memref<1x32xf32, #tpu.memory_space<vmem>>, %arg6: memref<32x8xf32, #tpu.memory_space<vmem>>, %arg7: memref<1x8xf32, #tpu.memory_space<vmem>>, %arg8: memref<8x8xi32, #tpu.memory_space<vmem>>, %arg9: memref<8x8xf32, #tpu.memory_space<vmem>>) attributes {dimension_semantics = [#tpu.dimension_semantics<parallel>], iteration_bounds = array<i64: 3>, scalar_prefetch = 0 : i64, scratch_operands = 0 : i64, tpu.core_type = #tpu.core_type<tc>, window_params = [{transform_indices = @transform_0, window_bounds = array<i64: 8, 16>}, {pipeline_mode = #tpu.pipeline_mode<synchronous>, transform_indices = @transform_1, window_bounds = array<i64: 16, 32>}, {pipeline_mode = #tpu.pipeline_mode<synchronous>, transform_indices = @transform_2, window_bounds = array<i64: 1, 32>}, {pipeline_mode = #tpu.pipeline_mode<synchronous>, transform_indices = @transform_3, window_bounds = array<i64: 32, 32>}, {pipeline_mode = #tpu.pipeline_mode<synchronous>, transform_indices = @transform_4, window_bounds = array<i64: 1, 32>}, {pipeline_mode = #tpu.pipeline_mode<synchronous>, transform_indices = @transform_5, window_bounds = array<i64: 32, 8>}, {pipeline_mode = #tpu.pipeline_mode<synchronous>, transform_indices = @transform_6, window_bounds = array<i64: 1, 8>}, {transform_indices = @transform_7, window_bounds = array<i64: 8, 8>}, {transform_indices = @transform_8, window_bounds = array<i64: 8, 8>}]} {
    %c0 = arith.constant 0 : index
    %c0_0 = arith.constant 0 : index
    %0 = vector.load %arg1[%c0, %c0_0] : memref<8x16xf32, #tpu.memory_space<vmem>>, vector<8x16xf32>
    %c0_1 = arith.constant 0 : index
    %c0_2 = arith.constant 0 : index
    %1 = vector.load %arg2[%c0_1, %c0_2] : memref<16x32xf32, #tpu.memory_space<vmem>>, vector<16x32xf32>
    %cst = arith.constant dense<0.000000e+00> : vector<8x32xf32>
    %2 = tpu.matmul %0, %1, %cst {dimension_numbers = #tpu.dot_dimension_numbers<[1], [0], [0], [1], [0, 0, 1, 1], [], []>} : vector<8x16xf32>, vector<16x32xf32>, vector<8x32xf32> -> vector<8x32xf32>
    %c0_3 = arith.constant 0 : index
    %c0_4 = arith.constant 0 : index
    %3 = vector.load %arg3[%c0_3, %c0_4] : memref<1x32xf32, #tpu.memory_space<vmem>>, vector<1x32xf32>
    %4 = vector.broadcast %3 : vector<1x32xf32> to vector<8x32xf32>
    %5 = arith.addf %2, %4 : vector<8x32xf32>
    %cst_5 = arith.constant 0.000000e+00 : f32
    %6 = vector.broadcast %cst_5 : f32 to vector<8x32xf32>
    %7 = arith.maximumf %5, %6 : vector<8x32xf32>
    %c0_6 = arith.constant 0 : index
    %c0_7 = arith.constant 0 : index
    %8 = vector.load %arg4[%c0_6, %c0_7] : memref<32x32xf32, #tpu.memory_space<vmem>>, vector<32x32xf32>
    %cst_8 = arith.constant dense<0.000000e+00> : vector<8x32xf32>
    %9 = tpu.matmul %7, %8, %cst_8 {dimension_numbers = #tpu.dot_dimension_numbers<[1], [0], [0], [1], [0, 0, 1, 1], [], []>} : vector<8x32xf32>, vector<32x32xf32>, vector<8x32xf32> -> vector<8x32xf32>
    %c0_9 = arith.constant 0 : index
    %c0_10 = arith.constant 0 : index
    %10 = vector.load %arg5[%c0_9, %c0_10] : memref<1x32xf32, #tpu.memory_space<vmem>>, vector<1x32xf32>
    %11 = vector.broadcast %10 : vector<1x32xf32> to vector<8x32xf32>
    %12 = arith.addf %9, %11 : vector<8x32xf32>
    %cst_11 = arith.constant 0.000000e+00 : f32
    %13 = vector.broadcast %cst_11 : f32 to vector<8x32xf32>
    %14 = arith.maximumf %12, %13 : vector<8x32xf32>
    %c0_12 = arith.constant 0 : index
    %c0_13 = arith.constant 0 : index
    %15 = vector.load %arg6[%c0_12, %c0_13] : memref<32x8xf32, #tpu.memory_space<vmem>>, vector<32x8xf32>
    %cst_14 = arith.constant dense<0.000000e+00> : vector<8x8xf32>
    %16 = tpu.matmul %14, %15, %cst_14 {dimension_numbers = #tpu.dot_dimension_numbers<[1], [0], [0], [1], [0, 0, 1, 1], [], []>} : vector<8x32xf32>, vector<32x8xf32>, vector<8x8xf32> -> vector<8x8xf32>
    %c0_15 = arith.constant 0 : index
    %c0_16 = arith.constant 0 : index
    %17 = vector.load %arg7[%c0_15, %c0_16] : memref<1x8xf32, #tpu.memory_space<vmem>>, vector<1x8xf32>
    %18 = vector.broadcast %17 : vector<1x8xf32> to vector<8x8xf32>
    %19 = arith.addf %16, %18 : vector<8x8xf32>
    %c0_17 = arith.constant 0 : index
    %c0_18 = arith.constant 0 : index
    %20 = vector.load %arg8[%c0_17, %c0_18] : memref<8x8xi32, #tpu.memory_space<vmem>>, vector<8x8xi32>
    %c0_i32 = arith.constant 0 : i32
    %21 = vector.broadcast %c0_i32 : i32 to vector<8x8xi32>
    %22 = arith.cmpi ne, %20, %21 : vector<8x8xi32>
    %cst_19 = arith.constant 0xFF800000 : f32
    %23 = vector.broadcast %cst_19 : f32 to vector<8x8xf32>
    %24 = arith.select %22, %19, %23 : vector<8x8xi1>, vector<8x8xf32>
    %c0_20 = arith.constant 0 : index
    %c0_21 = arith.constant 0 : index
    %25 = vector.load %arg9[%c0_20, %c0_21] : memref<8x8xf32, #tpu.memory_space<vmem>>, vector<8x8xf32>
    tpu.vector_store %arg9[%c0_20, %c0_21], %24 {strides = array<i32>} : memref<8x8xf32, #tpu.memory_space<vmem>>, vector<8x8xf32>,
    return
  }
  func.func @transform_0(%arg0: i32) -> (i32, i32) {
    %c0_i32 = arith.constant 0 : i32
    %c0_i32_0 = arith.constant 0 : i32
    return %arg0, %c0_i32 : i32, i32
  }
  func.func @transform_1(%arg0: i32) -> (i32, i32) {
    %c0_i32 = arith.constant 0 : i32
    %c0_i32_0 = arith.constant 0 : i32
    %c0_i32_1 = arith.constant 0 : i32
    return %c0_i32, %c0_i32_0 : i32, i32
  }
  func.func @transform_2(%arg0: i32) -> (i32, i32) {
    %c0_i32 = arith.constant 0 : i32
    %c0_i32_0 = arith.constant 0 : i32
    %c0_i32_1 = arith.constant 0 : i32
    return %c0_i32, %c0_i32_0 : i32, i32
  }
  func.func @transform_3(%arg0: i32) -> (i32, i32) {
    %c0_i32 = arith.constant 0 : i32
    %c0_i32_0 = arith.constant 0 : i32
    %c0_i32_1 = arith.constant 0 : i32
    return %c0_i32, %c0_i32_0 : i32, i32
  }
  func.func @transform_4(%arg0: i32) -> (i32, i32) {
    %c0_i32 = arith.constant 0 : i32
    %c0_i32_0 = arith.constant 0 : i32
    %c0_i32_1 = arith.constant 0 : i32
    return %c0_i32, %c0_i32_0 : i32, i32
  }
  func.func @transform_5(%arg0: i32) -> (i32, i32) {
    %c0_i32 = arith.constant 0 : i32
    %c0_i32_0 = arith.constant 0 : i32
    %c0_i32_1 = arith.constant 0 : i32
    return %c0_i32, %c0_i32_0 : i32, i32
  }
  func.func @transform_6(%arg0: i32) -> (i32, i32) {
    %c0_i32 = arith.constant 0 : i32
    %c0_i32_0 = arith.constant 0 : i32
    %c0_i32_1 = arith.constant 0 : i32
    return %c0_i32, %c0_i32_0 : i32, i32
  }
  func.func @transform_7(%arg0: i32) -> (i32, i32) {
    %c0_i32 = arith.constant 0 : i32
    %c0_i32_0 = arith.constant 0 : i32
    return %arg0, %c0_i32 : i32, i32
  }
  func.func @transform_8(%arg0: i32) -> (i32, i32) {
    %c0_i32 = arith.constant 0 : i32
    %c0_i32_0 = arith.constant 0 : i32
    return %arg0, %c0_i32 : i32, i32
  }
}

</mosaic_0001>

<bundles_post_ra>
// kernel: tpu_custom_call.1
= control target key start
LH: loop header
LB: loop body
LE: loop exit
PB: predicated region body
PF: predicated region fallthrough
CT: control target
= control target key end

     0   :  { %s766_s27 = smov 0   ;;  %s835_s0 = inlined_call_operand.vmem [shape: f32[24,16], index: 0, kind: input, shape index: {}]   ;;  %s836_s1 = inlined_call_operand.vmem [shape: f32[16,32], index: 1, kind: input, shape index: {}]   ;;  %s837_s2 = inlined_call_operand.vmem [shape: f32[1,32], index: 2, kind: input, shape index: {}]   ;;  %s838_s3 = inlined_call_operand.vmem [shape: f32[32,32], index: 3, kind: input, shape index: {}]   ;;  %s839_s4 = inlined_call_operand.vmem [shape: f32[1,32], index: 4, kind: input, shape index: {}]   ;;  %s840_s5 = inlined_call_operand.vmem [shape: f32[32,8], index: 5, kind: input, shape index: {}]   ;;  %s841_s6 = inlined_call_operand.vmem [shape: f32[1,8], index: 6, kind: input, shape index: {}]   ;;  %s842_s7 = inlined_call_operand.vmem [shape: s32[24,8], index: 7, kind: input, shape index: {}]   ;;  %s843_s8 = inlined_call_operand.vmem [shape: f32[24,8], index: 8, kind: output, shape index: {}]  }
   0x1 LB: > { %s643_s28 = sadd.s32 4294967295, %s717_s27   ;;  %p647_p0 = scmp.ge.s32.totalorder %s717_s27, 1  ;;  %s717_s27 = sphi %s766_s27, %s18_s27  }
   0x2   : > { %p270_p1 = scmp.lt.s32.totalorder %s717_s27, 4 }
   0x4   : > { %p271_p2 = pnand %p647_p0, %p270_p1 }
   0x5   : > { %p306_p3 = scmp.lt.s32.totalorder (!%p271_p2), %s643_s28, 2 }
   0x6   : > { %274 = sbr.rel (%p271_p2) target bundleno = 608 (0x260), region = 52 }
   0xb   : > { %v320_v0 = vld [vmem:[%s836_s1 + $0x8] sm:$0xff]  ;;  %v719_v1 = vmov 0.0   ;;  %v319_v2 = vld [vmem:[%s836_s1] sm:$0xff]  ;;  %vm720_vm0 = vmmov 0   ;;  %v406_v3 = vld [vmem:[%s838_s3 + $0x18] sm:$0xff]  ;;  %s845_s28 = smov (!%p306_p3, %s643_s28), 2 }
   0xc   : > { %672 = vmatprep.subr.mxu0 %v719_v1  ;;  %676 = vmatprep.mubr.msk.f32.mxu0 %vm720_vm0, %v719_v1  ;;  %s784_s13 = sshll.u32 %s845_s28, 3  ;;  %vm328_vm1 = vcmask 130048   ;;  %v405_v5 = vld [vmem:[%s838_s3 + $0x10] sm:$0xff]  ;;  %v404_v6 = vld [vmem:[%s838_s3 + $0x8] sm:$0xff]  ;;  %v403_v7 = vld [vmem:[%s838_s3] sm:$0xff]  ;;  %vm414_vm2 = vcmask 261120  }
   0xd   : > { %673 = vmatpush3.msra.mxu0 %v320_v0  ;;  %679 = vmatprep.subr.mxu1 %v719_v1  ;;  %s309_s16 = scalar_lea.vmem %s835_s0, %s784_s13  ;;  %v492_v8 = vld [vmem:[%s840_s5 + $0x18] sm:$0xff]  ;;  %v651_v9 = vld [vmem:[%s837_s2] ss:$0 sm:$0xff]  ;;  %v491_v14 = vld [vmem:[%s840_s5 + $0x10] sm:$0xff]  ;;  %s313_s17 = scalar_lea.vmem %s842_s7, %s784_s13  ;;  %vm576_vm4 = vcmask 64512  }
   0xe   : > { %674 = vmatprep.subr.mxu0 %v719_v1  ;;  %680 = vmatpush3.msra.mxu1 %v406_v3  ;;  %v318_v4 = vld [vmem:[%s309_s16] sm:$0xff]  ;;  %v490_v15 = vld [vmem:[%s840_s5 + $0x8] sm:$0xff]  ;;  %s317_s22 = scalar_lea.vmem %s843_s8, %s784_s13 }
   0xf   : > { %675 = vmatpush3.msra.mxu0 %v319_v2  ;;  %681 = vmatprep.subr.mxu1 %v719_v1  ;;  %v489_v16 = vld [vmem:[%s840_s5] sm:$0xff] }
  0x10   : > { %687 = vmatprep.mubr.msk.f32.mxu1 %vm720_vm0, %v719_v1  ;;  %690 = vmatprep.subr.mxu0 %v719_v1  ;;  %v653_v17 = vld [vmem:[%s839_s4] ss:$0 sm:$0xff] }
  0x11   : > { %677 = vmatmul.mubr.msk.f32.vlgmr.msra.gmra.mxu0 %vm328_vm1, %v318_v4  ;;  %682 = vmatpush3.msra.mxu1 %v405_v5  ;;  %v573_v22 = vld [vmem:[%s313_s17] sm:$0xff] }
  0x12   : > { %698 = vmatprep.mubr.msk.f32.mxu0 %vm720_vm0, %v719_v1  ;;  %683 = vmatprep.subr.mxu1 %v719_v1  ;;  %v655_v23 = vld [vmem:[%s841_s6] ss:$0 sm:$0xff]  ;;  %vm574_vm3 = vcmp.ne.s32.totalorder %v573_v22, 0 }
  0x13   : > { %684 = vmatpush3.msra.mxu1 %v404_v6  ;;  %691 = vmatpush3.msra.mxu0 %v492_v8 }
  0x14   : > { %685 = vmatprep.subr.mxu1 %v719_v1  ;;  %692 = vmatprep.subr.mxu0 %v719_v1 }
  0x15   : > { %686 = vmatpush3.msra.mxu1 %v403_v7  ;;  %693 = vmatpush3.msra.mxu0 %v491_v14 }
  0x16   : > { %694 = vmatprep.subr.mxu0 %v719_v1 }
  0x17   : > { %695 = vmatpush3.msra.mxu0 %v490_v15 }
  0x18   : > { %696 = vmatprep.subr.mxu0 %v719_v1 }
  0x19   : > { %697 = vmatpush3.msra.mxu0 %v489_v16 }
  0xd1   : > { %v398_v10 = vpop.f32.mrf.mxu0 }
  0xd2   : > { %v399_v11 = vadd.f32 %v651_v9, %v398_v10 }
  0xd3   : > { %v678_v12 = vpop.f32.mrf.mxu0 }
  0xd4   : > { %v402_v13 = vmax.f32 %v399_v11, 0.0 }
  0xd6   : > { %688 = vmatmul.mubr.msk.f32.vlgmr.msra.gmra.mxu1 %vm414_vm2, %v402_v13 }
 0x196   : > { %v484_v18 = vpop.f32.mrf.mxu1 }
 0x197   : > { %v485_v19 = vadd.f32 %v653_v17, %v484_v18 }
 0x198   : > { %v689_v20 = vpop.f32.mrf.mxu1 }
 0x199   : > { %v488_v21 = vmax.f32 %v485_v19, 0.0 }
 0x19b   : > { %699 = vmatmul.mubr.msk.f32.vlgmr.msra.gmra.mxu0 %vm414_vm2, %v488_v21 }
 0x25b   : > { %v569_v24 = vpop.f32.mrf.mxu0 }
 0x25c   : > { %v570_v25 = vadd.f32 %v655_v23, %v569_v24 }
 0x25d   : > { %v700_v26 = vpop.f32.mrf.mxu0 }
 0x25e   : > { %v575_v27 = vsel %vm574_vm3, %v570_v25, -inf }
 0x25f   : > { %577 = vst.msk [vmem:[%s317_s22] sm:$0xff] %vm576_vm4, %v575_v27 }
 0x260 PF: > { %s18_s27 = sadd.s32 1, %s717_s27  }
 0x261   : > { %p15_p4 = scmp.ge.s32.totalorder %s18_s27, 5  }
 0x263   :  { %17 = sbr.rel (!%p15_p4) target bundleno = 1 (0x1), region = 85 }

</bundles_post_ra>
